<compile_context>
chip_gen: v7x
topology: tpu7x:2x2x1
jax: 0.10.0
libtpu: 0.0.40
codegen_flags: <defaults>
</compile_context>

<pallas_src>
import jax
import jax.numpy as jnp
from jax.experimental import pallas as pl
from jax.experimental.pallas import tpu as pltpu


def _round_up(x, m):
    return ((x + m - 1) // m) * m


def _pad2d(a, rows, cols):
    r, c = a.shape
    if r == rows and c == cols:
        return a
    return jnp.pad(a, ((0, rows - r), (0, cols - c)))


# ------------------------------ kernel bodies --------------------------------


def _gcn_kernel_resident(adj_ref, x_ref, b_ref, o_ref):
    """x fully VMEM-resident: one matmul + bias per (tm, F) row tile."""
    o_ref[...] = (
        jnp.dot(adj_ref[...], x_ref[...], preferred_element_type=jnp.float32)
        + b_ref[...]
    ).astype(o_ref.dtype)


def _gcn_kernel_tiled(adj_ref, x_ref, b_ref, o_ref):
    """K (neighbor) axis tiled; accumulate directly into the f32 output tile."""
    k = pl.program_id(1)

    @pl.when(k == 0)
    def _():
        # Fold the bias into the accumulator init (no epilogue add pass).
        o_ref[...] = jnp.broadcast_to(b_ref[...], o_ref.shape).astype(o_ref.dtype)

    o_ref[...] += jnp.dot(
        adj_ref[...], x_ref[...], preferred_element_type=jnp.float32
    )


# --------------------------------- wrapper ------------------------------------


def graph_convolution(adj, x, bias=None, *, tm=None, tk=512,
                      compute_dtype=None,
                      vmem_budget_bytes=24 * 1024 * 1024):
    """pygcn GraphConvolution forward: out = adj @ x (+ bias).  Returns f32 (N, F)."""
    N, F = x.shape
    assert adj.shape == (N, N), adj.shape
    out_dtype = jnp.float32  # torch.FloatTensor semantics

    if compute_dtype is not None:
        adj = adj.astype(compute_dtype)
        x = x.astype(compute_dtype)
    in_bytes = jnp.dtype(adj.dtype).itemsize

    # Lane-dense feature dim (multiple of 128 -> unmasked vector stores).
    F_pad = max(128, _round_up(F, 128))
    bias_f32 = (jnp.zeros((F,), jnp.float32) if bias is None
                else bias.astype(jnp.float32))
    bias2d = jnp.pad(bias_f32, (0, F_pad - F)).reshape(1, F_pad)

    # Row tile: multiple of 128; keep the 'parallel' row axis >= 2 blocks so
    # both v7x TensorCores get work; 256 on larger graphs (v6e/v7x MXU shape).
    if tm is None:
        tm = 128 if N <= 256 else 256
    assert tm % 128 == 0 and tk % 128 == 0
    N_pad_m = _round_up(N, tm)

    # ---- Variant A: collapse K (x resident in VMEM). ----
    resident_bytes = (
        2 * tm * N_pad_m * in_bytes          # adj row tile (double-buffered)
        + 2 * N_pad_m * F_pad * in_bytes     # x (resident)
        + 2 * tm * F_pad * 4                 # output tile
        + 2 * F_pad * 4                      # bias
    )
    if resident_bytes <= vmem_budget_bytes:
        adj_p = _pad2d(adj, N_pad_m, N_pad_m)
        x_p = _pad2d(x, N_pad_m, F_pad)
        out = pl.pallas_call(
            _gcn_kernel_resident,
            out_shape=jax.ShapeDtypeStruct((N_pad_m, F_pad), out_dtype),
            grid_spec=pltpu.PrefetchScalarGridSpec(
                num_scalar_prefetch=0,
                grid=(N_pad_m // tm,),
                in_specs=[
                    pl.BlockSpec((tm, N_pad_m), lambda i: (i, 0)),     # adj rows
                    pl.BlockSpec((N_pad_m, F_pad), lambda i: (0, 0)),  # x resident
                    pl.BlockSpec((1, F_pad), lambda i: (0, 0)),        # bias
                ],
                out_specs=pl.BlockSpec((tm, F_pad), lambda i: (i, 0)),
            ),
            compiler_params=pltpu.CompilerParams(
                dimension_semantics=("parallel",)),
        )(adj_p, x_p, bias2d)
        return out[:N, :F]

    # ---- Variant B: tiled K axis, accumulate into the output tile. ----
    tk = min(tk, _round_up(N, 128))
    N_pad_k = _round_up(N, tk)
    adj_p = _pad2d(adj, N_pad_m, N_pad_k)
    x_p = _pad2d(x, N_pad_k, F_pad)

    tiled_bytes = (
        2 * tm * tk * in_bytes               # adj tile (double-buffered)
        + 2 * tk * F_pad * in_bytes          # x tile
        + 2 * tm * F_pad * 4                 # output tile
        + 2 * F_pad * 4                      # bias
    )
    cparams = dict(dimension_semantics=("parallel", "arbitrary"))
    if tiled_bytes > 24 * 1024 * 1024:
        # Re-derive scoped-VMEM for big tiles (esp. v7x's 64 MiB physical).
        cparams["vmem_limit_bytes"] = int(tiled_bytes * 1.5)

    out = pl.pallas_call(
        _gcn_kernel_tiled,
        out_shape=jax.ShapeDtypeStruct((N_pad_m, F_pad), out_dtype),
        grid_spec=pltpu.PrefetchScalarGridSpec(
            num_scalar_prefetch=0,
            grid=(N_pad_m // tm, N_pad_k // tk),
            in_specs=[
                pl.BlockSpec((tm, tk), lambda i, k: (i, k)),       # adj tile
                pl.BlockSpec((tk, F_pad), lambda i, k: (k, 0)),    # x tile
                pl.BlockSpec((1, F_pad), lambda i, k: (0, 0)),     # bias
            ],
            out_specs=pl.BlockSpec((tm, F_pad), lambda i, k: (i, 0)),
        ),
        compiler_params=pltpu.CompilerParams(**cparams),
    )(adj_p, x_p, bias2d)
    return out[:N, :F]


if __name__ == "__main__":
    N = 256          # number of graph nodes
    F = 128          # in_features == out_features (support == input)

    key = jax.random.PRNGKey(0)
    k_adj, k_x, k_b = jax.random.split(key, 3)

    # Deterministic "sparse-ish" adjacency, densified and row-normalized.
    raw = jax.random.uniform(k_adj, (N, N), dtype=jnp.float32)
    adj = jnp.where(raw > 0.9, raw, 0.0)
    adj = adj + jnp.eye(N, dtype=jnp.float32)               # self loops
    adj = adj / jnp.sum(adj, axis=1, keepdims=True)         # row-normalize

    x = jax.random.normal(k_x, (N, F), dtype=jnp.float32)
    # bias init as in pygcn: uniform(-1/sqrt(out_features), 1/sqrt(out_features))
    stdv = 1.0 / jnp.sqrt(jnp.float32(F))
    bias = jax.random.uniform(k_b, (F,), minval=-stdv, maxval=stdv,
                              dtype=jnp.float32)

    ref = adj @ x + bias

    # 1) Default path: K axis collapsed, x resident in VMEM.
    out = jax.block_until_ready(graph_convolution(adj, x, bias))
    assert out.shape == (N, F) and out.dtype == jnp.float32
    assert jnp.allclose(out, ref, atol=1e-4, rtol=1e-4)

    # 2) Tiled-K accumulation path (forced) — exercises the k-grid accumulate.
    out_t = jax.block_until_ready(
        graph_convolution(adj, x, bias, tk=128, vmem_budget_bytes=0))
    assert jnp.allclose(out_t, ref, atol=1e-4, rtol=1e-4)

    # 3) bf16 adj/x streams (f32 accumulation) — looser tolerance.
    out_bf16 = jax.block_until_ready(
        graph_convolution(adj, x, bias, compute_dtype=jnp.bfloat16))
    assert jnp.allclose(out_bf16, ref, atol=5e-2, rtol=5e-2)

    # 4) No-bias module + non-tile-multiple shapes (padding path).
    N2, F2 = 200, 64
    adj2 = adj[:N2, :N2]
    adj2 = adj2 / jnp.sum(adj2, axis=1, keepdims=True)
    x2 = x[:N2, :F2]
    out2 = jax.block_until_ready(graph_convolution(adj2, x2, None))
    assert out2.shape == (N2, F2)
    assert jnp.allclose(out2, adj2 @ x2, atol=1e-4, rtol=1e-4)

    print("KERNEL_OK")
</pallas_src>

<mosaic_0001>
module attributes {stable_mosaic.version = 11 : i64} {
  func.func @_gcn_kernel_resident(%arg0: i32, %arg1: memref<128x256xf32, #tpu.memory_space<vmem>>, %arg2: memref<256x128xf32, #tpu.memory_space<vmem>>, %arg3: memref<1x128xf32, #tpu.memory_space<vmem>>, %arg4: memref<128x128xf32, #tpu.memory_space<vmem>>) attributes {dimension_semantics = [#tpu.dimension_semantics<parallel>], iteration_bounds = array<i64: 2>, scalar_prefetch = 0 : i64, scratch_operands = 0 : i64, tpu.core_type = #tpu.core_type<tc>, window_params = [{transform_indices = @transform_0, window_bounds = array<i64: 128, 256>}, {pipeline_mode = #tpu.pipeline_mode<synchronous>, transform_indices = @transform_1, window_bounds = array<i64: 256, 128>}, {pipeline_mode = #tpu.pipeline_mode<synchronous>, transform_indices = @transform_2, window_bounds = array<i64: 1, 128>}, {transform_indices = @transform_3, window_bounds = array<i64: 128, 128>}]} {
    %c0 = arith.constant 0 : index
    %c0_0 = arith.constant 0 : index
    %0 = vector.load %arg1[%c0, %c0_0] : memref<128x256xf32, #tpu.memory_space<vmem>>, vector<128x256xf32>
    %c0_1 = arith.constant 0 : index
    %c0_2 = arith.constant 0 : index
    %1 = vector.load %arg2[%c0_1, %c0_2] : memref<256x128xf32, #tpu.memory_space<vmem>>, vector<256x128xf32>
    %cst = arith.constant dense<0.000000e+00> : vector<128x128xf32>
    %2 = tpu.matmul %0, %1, %cst {dimension_numbers = #tpu.dot_dimension_numbers<[1], [0], [0], [1], [0, 0, 1, 1], [], []>} : vector<128x256xf32>, vector<256x128xf32>, vector<128x128xf32> -> vector<128x128xf32>
    %c0_3 = arith.constant 0 : index
    %c0_4 = arith.constant 0 : index
    %3 = vector.load %arg3[%c0_3, %c0_4] : memref<1x128xf32, #tpu.memory_space<vmem>>, vector<1x128xf32>
    %4 = vector.broadcast %3 : vector<1x128xf32> to vector<128x128xf32>
    %5 = arith.addf %2, %4 : vector<128x128xf32>
    %c0_5 = arith.constant 0 : index
    %c0_6 = arith.constant 0 : index
    %6 = vector.load %arg4[%c0_5, %c0_6] : memref<128x128xf32, #tpu.memory_space<vmem>>, vector<128x128xf32>
    tpu.vector_store %arg4[%c0_5, %c0_6], %5 {strides = array<i32>} : memref<128x128xf32, #tpu.memory_space<vmem>>, vector<128x128xf32>,
    return
  }
  func.func @transform_0(%arg0: i32) -> (i32, i32) {
    %c0_i32 = arith.constant 0 : i32
    %c0_i32_0 = arith.constant 0 : i32
    return %arg0, %c0_i32 : i32, i32
  }
  func.func @transform_1(%arg0: i32) -> (i32, i32) {
    %c0_i32 = arith.constant 0 : i32
    %c0_i32_0 = arith.constant 0 : i32
    %c0_i32_1 = arith.constant 0 : i32
    return %c0_i32, %c0_i32_0 : i32, i32
  }
  func.func @transform_2(%arg0: i32) -> (i32, i32) {
    %c0_i32 = arith.constant 0 : i32
    %c0_i32_0 = arith.constant 0 : i32
    %c0_i32_1 = arith.constant 0 : i32
    return %c0_i32, %c0_i32_0 : i32, i32
  }
  func.func @transform_3(%arg0: i32) -> (i32, i32) {
    %c0_i32 = arith.constant 0 : i32
    %c0_i32_0 = arith.constant 0 : i32
    return %arg0, %c0_i32 : i32, i32
  }
}

</mosaic_0001>

<bundles_post_ra>
// kernel: tpu_custom_call.1
= control target key start
LH: loop header
LB: loop body
LE: loop exit
PB: predicated region body
PF: predicated region fallthrough
CT: control target
= control target key end

     0   :  { %8 = vsyncpa [#allocation3], 0  ;;  %s1183_s0 = inlined_call_operand.hbm [shape: f32[256,256], index: 0, kind: input, shape index: {}]   ;;  %s1184_s1 = inlined_call_operand.hbm [shape: f32[256,128], index: 1, kind: input, shape index: {}]   ;;  %s1185_s2 = inlined_call_operand.vmem [shape: f32[1,128], index: 2, kind: input, shape index: {}]   ;;  %s1186_s3 = inlined_call_operand.hbm [shape: f32[256,128], index: 3, kind: output, shape index: {}]  }
   0x1   :  { %10 = vsyncpa [#allocation3 + $0x1], 0 }
   0x2   :  { %11 = vsyncpa [#allocation6], 0 }
   0x3   :  { %12 = vsyncpa [#allocation4], 0 }
   0x4   :  { %14 = vsyncpa [#allocation4 + $0x1], 0  ;;  %s907_s12 = smov 0   ;;  %s909_s13 = smov 0  }
   0x5   :  { %s911_s14 = smov 0   ;;  %s913_s15 = smov 0  }
   0x6 LB: > { %s928_s16 = sadd.s32 4294967295, %s876_s15   ;;  %s536_s17 = sadd.s32 4294967294, %s876_s15   ;;  %s876_s15 = sphi %s913_s15, %s1206_s15   ;;  %s872_s14 = sphi %s911_s14, %s1205_s14   ;;  %s868_s13 = sphi %s909_s13, %s1204_s13   ;;  %s864_s12 = sphi %s907_s12, %s1203_s12  }
   0x7   : > { %p40_p0 = scmp.ne.s32.totalorder %s868_s13, %s864_s12  ;;  %p1187_p1 = scmp.eq.s32.totalorder %s928_s16, 0 }
   0x8   : > { %p112_p3 = scmp.eq.s32.totalorder %s536_s17, 1  ;;  %p537_p5 = scmp.ge.s32.totalorder %s876_s15, 1 }
   0x9   : > { %p937_p4 = por %p1187_p1, %p40_p0  ;;  %p119_p7 = scmp.lt.s32.totalorder %s876_s15, 3 }
   0xa   : > { %p942_p6 = por %p112_p3, %p40_p0  ;;  %s878_s21 = smov [#allocation5]  }
   0xb   : > { %s1190_s18 = scalar_select %p937_p4, 1, 0 }
   0xc   : > { %s1191_s19 = scalar_select %p942_p6, 1, 0 }
   0xd   : > { %p947_p8 = pnand %p537_p5, %p119_p7  ;;  %s131_s22 = sshll.u32 %s878_s21, 4  ;;  %s951_s22 = int_to_ptr.vmem [resolvable:$true] %s131_s22 }
   0xe   : > { %s963_s24 = sadd.s32 1, %s876_s15   ;;  %s27_s25 = sadd.s32 1, %s872_s14 }
   0xf   : > { %s1192_s20 = scalar_select %p947_p8, 1, 0 }
  0x10   : > { %p693_p9 = pneg %p947_p8  ;;  %s24_s26 = ssub.s32 %s876_s15, %s963_s24 }
  0x11   : > { %s748_s29 = scalar_lea.hbm %s1184_s1, 4096 }
  0x12   : > { %p958_p11 = pnand %p693_p9, %p1187_p1  ;;  %p749_p12 = scmp.ne.s32.totalorder %s1184_s1, %s748_s29 }
  0x13   : > { %p755_p5 = scmp.lt.u32.totalorder %s748_s29, %s1184_s1 }
  0x14   : > { %p750_p13 = pneg %p958_p11 }
  0x16   : > { %p751_p0 = pnand %p750_p13, %p749_p12 }
  0x18   : > { %p752_p3 = pneg %p751_p0 }
  0x1a   : > { %p757_p7 = pnand %p755_p5, %p752_p3 }
  0x1c   : > { %760 = shalt.err (!%p757_p7)
}
  0x1d   : > { %s761_s7 = scalar_lea.vmem %s951_s22, 4096  ;;  %p769_p2 = scmp.lt.s32.totalorder %s951_s22, %s951_s22 }
  0x1e   : > { %p762_p9 = scmp.ne.s32.totalorder %s951_s22, %s761_s7  ;;  %p770_p6 = scmp.lt.s32.totalorder %s761_s7, %s761_s7 }
  0x20   : > { %p764_p10 = pnand %p762_p9, %p750_p13  ;;  %p771_p4 = por %p770_p6, %p769_p2 }
  0x22   : > { %p765_p1 = pneg %p764_p10 }
  0x24   : > { %p772_p8 = pnand %p771_p4, %p765_p1 }
  0x26   : > { %775 = shalt.err (!%p772_p8)
}
  0x27   : > { %s879_s8 = smov 128   ;;  %s880_s9 = smov 8  }
  0x28   : > { %696 = dma.hbm_to_vmem [thread:$0]  (!%p958_p11), %s1184_s1, 4096, %s951_s22, [#allocation6], %s879_s8, %s879_s8, %s880_s9  }
  0x29   : > { %p25_p2 = scmp.eq.s32.totalorder %s24_s26, 0  ;;  %p34_p1 = scmp.ne.s32.totalorder %s872_s14, %s868_s13 }
  0x2a   : > { %p35_p4 = scmp.eq.s32.totalorder %s876_s15, 0  ;;  %p706_p6 = scmp.lt.s32.totalorder %s876_s15, 2 }
  0x2b   : > { %s994_s17 = scalar_select %p25_p2, %s872_s14, %s27_s25  }
  0x2c   : > { %p36_p8 = por %p35_p4, %p34_p1  ;;  %p1194_p10 = scmp.eq.s32.totalorder %s928_s16, 1 }
  0x2d   : > { %s148_s27 = sand.u32 1, %s872_s14   ;;  %s555_s28 = sshll.u32 %s876_s15, 12 }
  0x2e   : > { %p998_p12 = por %p1194_p10, %p34_p1  ;;  %s540_s29 = sshll.u32 %s148_s27, 8 }
  0x2f   : > { %s1007_s4 = scalar_lea.hbm %s1183_s0, %s555_s28  ;;  %s152_s22 = scalar_lea.vmem [#allocation2], %s540_s29 }
  0x30   : > { %s160_s25 = sshll.u32 %s152_s22, 4  ;;  %p1009_p11 = pnand %p706_p6, %p36_p8  ;;  %s1013_s25 = int_to_ptr.vmem [resolvable:$true] %s160_s25 }
  0x31   : > { %s1015_s5 = scalar_lea.sflag [#allocation3], %s148_s27  ;;  %s776_s6 = scalar_lea.hbm %s1007_s4, 4096 }
  0x32   : > { %p777_p13 = scmp.ne.s32.totalorder %s1007_s4, %s776_s6  ;;  %p778_p0 = pneg %p1009_p11 }
  0x33   : > { %s781_s9 = scalar_lea.hbm %s1183_s0, 8192  ;;  %p782_p7 = scmp.lt.u32.totalorder %s1007_s4, %s1183_s0 }
  0x34   : > { %p779_p3 = pnand %p778_p0, %p777_p13  ;;  %p783_p9 = scmp.lt.u32.totalorder %s781_s9, %s776_s6 }
  0x35   : > { %p785_p1 = scmp.lt.u32.totalorder %s776_s6, %s1007_s4 }
  0x36   : > { %p780_p5 = pneg %p779_p3  ;;  %p784_p2 = por %p783_p9, %p782_p7 }
  0x38   : > { %p786_p4 = por %p785_p1, %p784_p2 }
  0x3a   : > { %p787_p6 = pnand %p786_p4, %p780_p5 }
  0x3c   : > { %790 = shalt.err (!%p787_p6)
}
  0x3d   : > { %s791_s27 = scalar_lea.vmem %s1013_s25, 4096  ;;  %s881_s28 = smov [#allocation2]  }
  0x3e   : > { %p792_p8 = scmp.ne.s32.totalorder %s1013_s25, %s791_s27  ;;  %s796_s29 = sshll.u32 %s881_s28, 4  ;;  %s797_s29 = int_to_ptr.vmem [resolvable:$false] %s796_s29 }
  0x3f   : > { %s798_s23 = scalar_lea.vmem %s797_s29, 8192  ;;  %p799_p3 = scmp.lt.s32.totalorder %s1013_s25, %s797_s29 }
  0x40   : > { %p794_p10 = pnand %p792_p8, %p778_p0  ;;  %p800_p7 = scmp.lt.s32.totalorder %s798_s23, %s791_s27 }
  0x42   : > { %p795_p13 = pneg %p794_p10  ;;  %p801_p9 = por %p800_p7, %p799_p3 }
  0x44   : > { %p802_p2 = pnand %p801_p9, %p795_p13 }
  0x46   : > { %805 = shalt.err (!%p802_p2)
}
  0x47   : > { %s882_s30 = smov 256   ;;  %s883_s22 = smov 16  }
  0x48   : > { %700 = dma.hbm_to_vmem [thread:$0]  (!%p1009_p11), %s1007_s4, 4096, %s1013_s25, %s1015_s5, %s882_s30, %s882_s30, %s883_s22  }
  0x49   : > { %p1197_p0 = scmp.ne.s32.totalorder %s1192_s20, 0 }
  0x4a   : > { %s1046_s6 = sand.u32 (!%p1197_p0), 1, %s868_s13   ;;  %p1198_p5 = scmp.ne.s32.totalorder (!%p1197_p0), %s1190_s18, 0 }
  0x4b   : > { %172 = sbr.rel (%p1197_p0) target bundleno = 381 (0x17d), region = 32  ;;  %s545_s7 = sshll.u32 (!%p1197_p0), %s1046_s6, 8 }
  0x4c   : > { %s175_s8 = scalar_lea.sflag (!%p1197_p0), [#allocation3], %s1046_s6  ;;  %s1050_s9 = scalar_lea.vmem (!%p1197_p0), [#allocation2], %s545_s7 }
  0x52   : > { %851 = dma.done.wait (%p1198_p5), %s175_s8, 4096  }
  0x53   : > { %853 = vsyncadd (%p1198_p5), %s175_s8, 4294963200  ;;  %p1199_p11 = scmp.eq.s32.totalorder %s928_s16, 0 }
  0x55   : > { %855 = dma.done.wait (%p1199_p11), [#allocation6], 4096   ;;  %p1200_p1 = pmov %p1199_p11 }
  0x56   : > { %v255_v0 = vld [vmem:[#allocation5 + $0x80] sm:$0xff]  ;;  %v256_v1 = vld [vmem:[#allocation5 + $0x88] sm:$0xff]  ;;  %v257_v5 = vld [vmem:[#allocation5 + $0x90] sm:$0xff]  ;;  %s547_s18 = sshll.u32 %s1046_s6, 7  ;;  %s556_s26 = sshll.u32 %s928_s16, 11 }
  0x57   : > { %857 = vsyncadd (%p1200_p1), [#allocation6], 4294963200  ;;  %v239_v2 = vld [vmem:[#allocation5] sm:$0xff]  ;;  %v637_v3 = vpack.c.bf16 %v256_v1, %v255_v0  ;;  %v240_v4 = vld [vmem:[#allocation5 + $0x8] sm:$0xff]  ;;  %s1100_s25 = scalar_lea.vmem [#allocation7], %s547_s18  ;;  %s1133_s27 = scalar_lea.hbm %s1186_s3, %s556_s26 }
  0x58   : > { %v258_v6 = vld [vmem:[#allocation5 + $0x98] sm:$0xff]  ;;  %v639_v7 = vpack.c.bf16 %v240_v4, %v239_v2  ;;  %v241_v9 = vld [vmem:[#allocation5 + $0x10] sm:$0xff]  ;;  %v259_v11 = vld [vmem:[#allocation5 + $0xa0] sm:$0xff]  ;;  %s453_s5 = sshll.u32 %s1100_s25, 4  ;;  %s440_s16 = scalar_lea.sflag [#allocation4], %s1046_s6  ;;  %s1135_s5 = int_to_ptr.vmem [resolvable:$true] %s453_s5 }
  0x59   : > { %v641_v8 = vpack.c.bf16 %v258_v6, %v257_v5  ;;  %v242_v10 = vld [vmem:[#allocation5 + $0x18] sm:$0xff]  ;;  %638 = vmatprep.subr.bf16.mxu0 %v637_v3  ;;  %669 = vmatprep.subr.bf16.mxu1 %v637_v3  ;;  %v260_v12 = vld [vmem:[#allocation5 + $0xa8] sm:$0xff]  ;;  %v243_v15 = vld [vmem:[#allocation5 + $0x20] sm:$0xff]  ;;  %s806_s28 = scalar_lea.vmem %s1135_s5, 2048  ;;  %s884_s29 = smov [#allocation7]  }
  0x5a   : > { %640 = vmatpush3.bf16.msra.mxu0 %v639_v7  ;;  %677 = vmatpush3.bf16.msra.mxu1 %v639_v7  ;;  %v643_v13 = vpack.c.bf16 %v242_v10, %v241_v9  ;;  %v645_v14 = vpack.c.bf16 %v260_v12, %v259_v11  ;;  %v244_v16 = vld [vmem:[#allocation5 + $0x28] sm:$0xff]  ;;  %v261_v17 = vld [vmem:[#allocation5 + $0xb0] sm:$0xff]  ;;  %v262_v18 = vld [vmem:[#allocation5 + $0xb8] sm:$0xff]  ;;  %p807_p4 = scmp.ne.s32.totalorder %s1135_s5, %s806_s28  ;;  %s810_s23 = sshll.u32 %s884_s29, 4  ;;  %s811_s23 = int_to_ptr.vmem [resolvable:$false] %s810_s23 }
  0x5b   : > { %642 = vmatprep.subr.bf16.mxu0 %v641_v8  ;;  %670 = vmatprep.subr.bf16.mxu1 %v641_v8  ;;  %v647_v19 = vpack.c.bf16 %v244_v16, %v243_v15  ;;  %v649_v20 = vpack.c.bf16 %v262_v18, %v261_v17  ;;  %v245_v21 = vld [vmem:[#allocation5 + $0x30] sm:$0xff]  ;;  %v246_v22 = vld [vmem:[#allocation5 + $0x38] sm:$0xff]  ;;  %v263_v23 = vld [vmem:[#allocation5 + $0xc0] sm:$0xff]  ;;  %s812_s30 = scalar_lea.vmem %s811_s23, 4096  ;;  %p813_p10 = scmp.lt.s32.totalorder %s1135_s5, %s811_s23 }
  0x5c   : > { %v264_v24 = vld [vmem:[#allocation5 + $0xc8] sm:$0xff]  ;;  %v651_v27 = vpack.c.bf16 %v246_v22, %v245_v21  ;;  %v247_v29 = vld [vmem:[#allocation5 + $0x40] sm:$0xff]  ;;  %v265_v31 = vld [vmem:[#allocation5 + $0xd0] sm:$0xff]  ;;  %p808_p6 = pnand %p807_p4, %p998_p12  ;;  %p814_p13 = scmp.lt.s32.totalorder %s812_s30, %s806_s28 }
  0x5d   : > { %v208_v25 = vld [vmem:[%s1050_s9 + $0x8] sm:$0xff]  ;;  %v653_v28 = vpack.c.bf16 %v264_v24, %v263_v23  ;;  %v266_v32 = vld [vmem:[#allocation5 + $0xd8] sm:$0xff]  ;;  %v249_v35 = vld [vmem:[#allocation5 + $0x50] sm:$0xff] }
  0x5e   : > { %644 = vmatpush3.bf16.msra.mxu0 %v643_v13  ;;  %678 = vmatpush3.bf16.msra.mxu1 %v643_v13  ;;  %v224_v26 = vld [vmem:[%s1050_s9 + $0x88] sm:$0xff]  ;;  %v657_v34 = vpack.c.bf16 %v266_v32, %v265_v31  ;;  %v250_v36 = vld [vmem:[#allocation5 + $0x58] sm:$0xff]  ;;  %v267_v37 = vld [vmem:[#allocation5 + $0xe0] sm:$0xff]  ;;  %p809_p8 = pneg %p808_p6  ;;  %p815_p3 = por %p814_p13, %p813_p10 }
  0x5f   : > { %646 = vmatprep.subr.bf16.mxu0 %v645_v14  ;;  %671 = vmatprep.subr.bf16.mxu1 %v645_v14  ;;  %v248_v30 = vld [vmem:[#allocation5 + $0x48] sm:$0xff]  ;;  %v659_v39 = vpack.c.bf16 %v250_v36, %v249_v35  ;;  %v251_v41 = vld [vmem:[#allocation5 + $0x60] sm:$0xff]  ;;  %v269_v43 = vld [vmem:[#allocation5 + $0xf0] sm:$0xff] }
  0x60   : > { %342 = vmatprep.mubr.f32.mxu0 %v208_v25  ;;  %382 = vmatprep.mubr.f32.mxu1 %v224_v26  ;;  %v655_v33 = vpack.c.bf16 %v248_v30, %v247_v29  ;;  %v268_v38 = vld [vmem:[#allocation5 + $0xe8] sm:$0xff]  ;;  %v270_v44 = vld [vmem:[#allocation5 + $0xf8] sm:$0xff]  ;;  %v253_v47 = vld [vmem:[#allocation5 + $0x70] sm:$0xff]  ;;  %p816_p7 = pnand %p815_p3, %p809_p8 }
  0x61   : > { %v661_v40 = vpack.c.bf16 %v268_v38, %v267_v37  ;;  %v252_v42 = vld [vmem:[#allocation5 + $0x68] sm:$0xff]  ;;  %v665_v46 = vpack.c.bf16 %v270_v44, %v269_v43  ;;  %v254_v48 = vld [vmem:[#allocation5 + $0x78] sm:$0xff]  ;;  %v207_v50 = vld [vmem:[%s1050_s9] sm:$0xff] }
  0x62   : > { %648 = vmatpush3.bf16.msra.mxu0 %v647_v19  ;;  %679 = vmatpush3.bf16.msra.mxu1 %v647_v19  ;;  %v663_v45 = vpack.c.bf16 %v252_v42, %v251_v41  ;;  %v667_v49 = vpack.c.bf16 %v254_v48, %v253_v47  ;;  %v223_v51 = vld [vmem:[%s1050_s9 + $0x80] sm:$0xff]  ;;  %v210_v52 = vld [vmem:[%s1050_s9 + $0x18] sm:$0xff]  ;;  %v209_v54 = vld [vmem:[%s1050_s9 + $0x10] sm:$0xff] }
  0x63   : > { %650 = vmatprep.subr.bf16.mxu0 %v649_v20  ;;  %672 = vmatprep.subr.bf16.mxu1 %v649_v20  ;;  %v226_v53 = vld [vmem:[%s1050_s9 + $0x98] sm:$0xff]  ;;  %v225_v55 = vld [vmem:[%s1050_s9 + $0x90] sm:$0xff]  ;;  %v212_v56 = vld [vmem:[%s1050_s9 + $0x28] sm:$0xff] }
  0x64   : > { %v228_v57 = vld [vmem:[%s1050_s9 + $0xa8] sm:$0xff]  ;;  %v211_v58 = vld [vmem:[%s1050_s9 + $0x20] sm:$0xff]  ;;  %v214_v60 = vld [vmem:[%s1050_s9 + $0x38] sm:$0xff] }
  0x65   : > { %v227_v59 = vld [vmem:[%s1050_s9 + $0xa0] sm:$0xff]  ;;  %v230_v61 = vld [vmem:[%s1050_s9 + $0xb8] sm:$0xff]  ;;  %v213_v62 = vld [vmem:[%s1050_s9 + $0x30] sm:$0xff] }
  0x66   : > { %652 = vmatpush3.bf16.msra.mxu0 %v651_v27  ;;  %680 = vmatpush3.bf16.msra.mxu1 %v651_v27  ;;  %v229_v63 = vld [vmem:[%s1050_s9 + $0xb0] sm:$0xff]  ;;  %v216_v0 = vld [vmem:[%s1050_s9 + $0x48] sm:$0xff]  ;;  %v215_v2 = vld [vmem:[%s1050_s9 + $0x40] sm:$0xff] }
  0x67   : > { %654 = vmatprep.subr.bf16.mxu0 %v653_v28  ;;  %673 = vmatprep.subr.bf16.mxu1 %v653_v28  ;;  %v232_v1 = vld [vmem:[%s1050_s9 + $0xc8] sm:$0xff]  ;;  %v231_v3 = vld [vmem:[%s1050_s9 + $0xc0] sm:$0xff]  ;;  %v218_v4 = vld [vmem:[%s1050_s9 + $0x58] sm:$0xff] }
  0x68   : > { %v234_v5 = vld [vmem:[%s1050_s9 + $0xd8] sm:$0xff]  ;;  %v217_v6 = vld [vmem:[%s1050_s9 + $0x50] sm:$0xff]  ;;  %v220_v8 = vld [vmem:[%s1050_s9 + $0x68] sm:$0xff] }
  0x69   : > { %v233_v7 = vld [vmem:[%s1050_s9 + $0xd0] sm:$0xff]  ;;  %v236_v9 = vld [vmem:[%s1050_s9 + $0xe8] sm:$0xff]  ;;  %v219_v10 = vld [vmem:[%s1050_s9 + $0x60] sm:$0xff] }
  0x6a   : > { %656 = vmatpush3.bf16.msra.mxu0 %v655_v33  ;;  %681 = vmatpush3.bf16.msra.mxu1 %v655_v33  ;;  %v235_v11 = vld [vmem:[%s1050_s9 + $0xe0] sm:$0xff]  ;;  %v222_v12 = vld [vmem:[%s1050_s9 + $0x78] sm:$0xff]  ;;  %v221_v14 = vld [vmem:[%s1050_s9 + $0x70] sm:$0xff] }
  0x6b   : > { %658 = vmatprep.subr.bf16.mxu0 %v657_v34  ;;  %674 = vmatprep.subr.bf16.mxu1 %v657_v34  ;;  %v238_v13 = vld [vmem:[%s1050_s9 + $0xf8] sm:$0xff]  ;;  %v237_v15 = vld [vmem:[%s1050_s9 + $0xf0] sm:$0xff]  ;;  %v1096_v18 = vld [vmem:[%s1185_s2] ss:$0 sm:$0xff] }
  0x6e   : > { %660 = vmatpush3.bf16.msra.mxu0 %v659_v39  ;;  %682 = vmatpush3.bf16.msra.mxu1 %v659_v39 }
  0x6f   : > { %662 = vmatprep.subr.bf16.mxu0 %v661_v40  ;;  %675 = vmatprep.subr.bf16.mxu1 %v661_v40 }
  0x72   : > { %664 = vmatpush3.bf16.msra.mxu0 %v663_v45  ;;  %683 = vmatpush3.bf16.msra.mxu1 %v663_v45 }
  0x73   : > { %666 = vmatprep.subr.bf16.mxu0 %v665_v46  ;;  %676 = vmatprep.subr.bf16.mxu1 %v665_v46 }
  0x76   : > { %668 = vmatpush3.bf16.msra.mxu0 %v667_v49  ;;  %684 = vmatpush3.bf16.msra.mxu1 %v667_v49 }
  0x79   : > { %343 = vmatmul.mubr.f32.vlgmr.msra.gmra.mrb[0].mxu0 %v207_v50  ;;  %383 = vmatmul.mubr.f32.vlgmr.msra.gmra.mrb[0].mxu1 %v223_v51 }
  0x7a   : > { %347 = vmatprep.mubr.f32.mxu0 %v210_v52  ;;  %387 = vmatprep.mubr.f32.mxu1 %v226_v53 }
  0x7d   : > { %348 = vmatmul.mubr.f32.gmra.mrb[2].mxu0 %v209_v54  ;;  %388 = vmatmul.mubr.f32.gmra.mrb[2].mxu1 %v225_v55 }
  0x7e   : > { %352 = vmatprep.mubr.f32.mxu0 %v212_v56  ;;  %392 = vmatprep.mubr.f32.mxu1 %v228_v57 }
  0x81   : > { %353 = vmatmul.mubr.f32.gmra.mrb[4].mxu0 %v211_v58  ;;  %393 = vmatmul.mubr.f32.gmra.mrb[4].mxu1 %v227_v59 }
  0x82   : > { %357 = vmatprep.mubr.f32.mxu0 %v214_v60  ;;  %397 = vmatprep.mubr.f32.mxu1 %v230_v61 }
  0x85   : > { %358 = vmatmul.mubr.f32.gmra.mrb[6].mxu0 %v213_v62  ;;  %398 = vmatmul.mubr.f32.gmra.mrb[6].mxu1 %v229_v63 }
  0x86   : > { %362 = vmatprep.mubr.f32.mxu0 %v216_v0  ;;  %402 = vmatprep.mubr.f32.mxu1 %v232_v1 }
  0x89   : > { %363 = vmatmul.mubr.f32.gmra.mrb[8].mxu0 %v215_v2  ;;  %403 = vmatmul.mubr.f32.gmra.mrb[8].mxu1 %v231_v3 }
  0x8a   : > { %367 = vmatprep.mubr.f32.mxu0 %v218_v4  ;;  %407 = vmatprep.mubr.f32.mxu1 %v234_v5 }
  0x8d   : > { %368 = vmatmul.mubr.f32.gmra.mrb[10].mxu0 %v217_v6  ;;  %408 = vmatmul.mubr.f32.gmra.mrb[10].mxu1 %v233_v7 }
  0x8e   : > { %372 = vmatprep.mubr.f32.mxu0 %v220_v8  ;;  %412 = vmatprep.mubr.f32.mxu1 %v236_v9 }
  0x91   : > { %373 = vmatmul.mubr.f32.gmra.mrb[12].mxu0 %v219_v10  ;;  %413 = vmatmul.mubr.f32.gmra.mrb[12].mxu1 %v235_v11 }
  0x92   : > { %377 = vmatprep.mubr.f32.mxu0 %v222_v12  ;;  %417 = vmatprep.mubr.f32.mxu1 %v238_v13 }
  0x95   : > { %378 = vmatmul.mubr.f32.gmra.mrb[14].mxu0 %v221_v14  ;;  %418 = vmatmul.mubr.f32.gmra.mrb[14].mxu1 %v237_v15 }
 0x14c   : > { %v589_v16 = vpop.f32.mrb[0].mxu0  ;;  %v613_v17 = vpop.f32.mrb[0].mxu1 }
 0x14d   : > { %v590_v19 = vpop.f32.mrb[1].mxu0  ;;  %v614_v20 = vpop.f32.mrb[1].mxu1 }
 0x14e   : > { %v591_v21 = vadd.f32 %v590_v19, %v589_v16  ;;  %v615_v22 = vadd.f32 %v614_v20, %v613_v17 }
 0x150   : > { %v345_v23 = vadd.f32 %v591_v21, %v1096_v18  ;;  %v385_v24 = vadd.f32 %v615_v22, %v1096_v18  ;;  %v592_v25 = vpop.f32.mrb[2].mxu0  ;;  %v616_v26 = vpop.f32.mrb[2].mxu1 }
 0x151   : > { %v593_v27 = vpop.f32.mrb[3].mxu0  ;;  %v617_v28 = vpop.f32.mrb[3].mxu1 }
 0x152   : > { %423 = vst [vmem:[%s1100_s25] sm:$0xff] %v345_v23  ;;  %431 = vst [vmem:[%s1100_s25 + $0x40] sm:$0xff] %v385_v24  ;;  %v594_v29 = vadd.f32 %v593_v27, %v592_v25  ;;  %v618_v30 = vadd.f32 %v617_v28, %v616_v26 }
 0x154   : > { %v350_v31 = vadd.f32 %v594_v29, %v1096_v18  ;;  %v390_v32 = vadd.f32 %v618_v30, %v1096_v18  ;;  %v595_v33 = vpop.f32.mrb[4].mxu0  ;;  %v619_v34 = vpop.f32.mrb[4].mxu1 }
 0x155   : > { %v596_v35 = vpop.f32.mrb[5].mxu0  ;;  %v620_v36 = vpop.f32.mrb[5].mxu1 }
 0x156   : > { %424 = vst [vmem:[%s1100_s25 + $0x8] sm:$0xff] %v350_v31  ;;  %432 = vst [vmem:[%s1100_s25 + $0x48] sm:$0xff] %v390_v32  ;;  %v597_v37 = vadd.f32 %v596_v35, %v595_v33  ;;  %v621_v38 = vadd.f32 %v620_v36, %v619_v34 }
 0x158   : > { %v355_v39 = vadd.f32 %v597_v37, %v1096_v18  ;;  %v395_v40 = vadd.f32 %v621_v38, %v1096_v18  ;;  %v598_v41 = vpop.f32.mrb[6].mxu0  ;;  %v622_v42 = vpop.f32.mrb[6].mxu1 }
 0x159   : > { %v599_v43 = vpop.f32.mrb[7].mxu0  ;;  %v623_v44 = vpop.f32.mrb[7].mxu1 }
 0x15a   : > { %425 = vst [vmem:[%s1100_s25 + $0x10] sm:$0xff] %v355_v39  ;;  %433 = vst [vmem:[%s1100_s25 + $0x50] sm:$0xff] %v395_v40  ;;  %v600_v45 = vadd.f32 %v599_v43, %v598_v41  ;;  %v624_v46 = vadd.f32 %v623_v44, %v622_v42 }
 0x15c   : > { %v360_v47 = vadd.f32 %v600_v45, %v1096_v18  ;;  %v400_v48 = vadd.f32 %v624_v46, %v1096_v18  ;;  %v601_v49 = vpop.f32.mrb[8].mxu0  ;;  %v625_v50 = vpop.f32.mrb[8].mxu1 }
 0x15d   : > { %v602_v51 = vpop.f32.mrb[9].mxu0  ;;  %v626_v52 = vpop.f32.mrb[9].mxu1 }
 0x15e   : > { %426 = vst [vmem:[%s1100_s25 + $0x18] sm:$0xff] %v360_v47  ;;  %434 = vst [vmem:[%s1100_s25 + $0x58] sm:$0xff] %v400_v48  ;;  %v603_v53 = vadd.f32 %v602_v51, %v601_v49  ;;  %v627_v54 = vadd.f32 %v626_v52, %v625_v50 }
 0x160   : > { %v365_v55 = vadd.f32 %v603_v53, %v1096_v18  ;;  %v405_v56 = vadd.f32 %v627_v54, %v1096_v18  ;;  %v604_v57 = vpop.f32.mrb[10].mxu0  ;;  %v628_v58 = vpop.f32.mrb[10].mxu1 }
 0x161   : > { %v605_v59 = vpop.f32.mrb[11].mxu0  ;;  %v629_v60 = vpop.f32.mrb[11].mxu1 }
 0x162   : > { %427 = vst [vmem:[%s1100_s25 + $0x20] sm:$0xff] %v365_v55  ;;  %435 = vst [vmem:[%s1100_s25 + $0x60] sm:$0xff] %v405_v56  ;;  %v606_v61 = vadd.f32 %v605_v59, %v604_v57  ;;  %v630_v62 = vadd.f32 %v629_v60, %v628_v58 }
 0x164   : > { %v370_v63 = vadd.f32 %v606_v61, %v1096_v18  ;;  %v410_v0 = vadd.f32 %v630_v62, %v1096_v18  ;;  %v607_v1 = vpop.f32.mrb[12].mxu0  ;;  %v631_v2 = vpop.f32.mrb[12].mxu1 }
 0x165   : > { %v608_v3 = vpop.f32.mrb[13].mxu0  ;;  %v632_v4 = vpop.f32.mrb[13].mxu1 }
 0x166   : > { %428 = vst [vmem:[%s1100_s25 + $0x28] sm:$0xff] %v370_v63  ;;  %436 = vst [vmem:[%s1100_s25 + $0x68] sm:$0xff] %v410_v0  ;;  %v609_v5 = vadd.f32 %v608_v3, %v607_v1  ;;  %v633_v6 = vadd.f32 %v632_v4, %v631_v2 }
 0x168   : > { %v375_v7 = vadd.f32 %v609_v5, %v1096_v18  ;;  %v415_v8 = vadd.f32 %v633_v6, %v1096_v18  ;;  %v610_v9 = vpop.f32.mrb[14].mxu0  ;;  %v634_v10 = vpop.f32.mrb[14].mxu1 }
 0x169   : > { %v611_v11 = vpop.f32.mrb[15].mxu0  ;;  %v635_v12 = vpop.f32.mrb[15].mxu1 }
 0x16a   : > { %429 = vst [vmem:[%s1100_s25 + $0x30] sm:$0xff] %v375_v7  ;;  %437 = vst [vmem:[%s1100_s25 + $0x70] sm:$0xff] %v415_v8  ;;  %v612_v13 = vadd.f32 %v611_v11, %v610_v9  ;;  %v636_v14 = vadd.f32 %v635_v12, %v634_v10 }
 0x16c   : > { %v380_v15 = vadd.f32 %v612_v13, %v1096_v18  ;;  %v420_v16 = vadd.f32 %v636_v14, %v1096_v18 }
 0x16e   : > { %430 = vst [vmem:[%s1100_s25 + $0x38] sm:$0xff] %v380_v15  ;;  %438 = vst [vmem:[%s1100_s25 + $0x78] sm:$0xff] %v420_v16 }
 0x16f   : > { %819 = shalt.err (!%p816_p7)
}
 0x170   : > { %s820_s22 = scalar_lea.hbm %s1133_s27, 2048  ;;  %s824_s9 = scalar_lea.hbm %s1186_s3, 4096 }
 0x171   : > { %p821_p9 = scmp.ne.s32.totalorder %s1133_s27, %s820_s22  ;;  %p825_p5 = scmp.lt.u32.totalorder %s1133_s27, %s1186_s3 }
 0x172   : > { %p826_p11 = scmp.lt.u32.totalorder %s824_s9, %s820_s22  ;;  %p828_p4 = scmp.lt.u32.totalorder %s820_s22, %s1133_s27 }
 0x173   : > { %p822_p2 = pnand %p821_p9, %p998_p12 }
 0x174   : > { %p827_p1 = por %p826_p11, %p825_p5 }
 0x175   : > { %p823_p0 = pneg %p822_p2 }
 0x176   : > { %p829_p6 = por %p828_p4, %p827_p1 }
 0x178   : > { %p830_p8 = pnand %p829_p6, %p823_p0 }
 0x17a   : > { %833 = shalt.err (!%p830_p8)
}
 0x17b   : > { %s885_s4 = smov 128   ;;  %s886_s25 = smov 8  }
 0x17c   : > { %691 = dma.vmem_to_hbm [thread:$0]  (%p998_p12), %s1135_s5, 2048, %s1133_s27, %s440_s16, %s885_s4, %s885_s4, %s886_s25  }
 0x17d PF: > { %s468_s26 = sand.u32 1, %s864_s12   ;;  %p1201_p10 = scmp.ne.s32.totalorder %s1191_s19, 0 }
 0x17e   : > { %p1202_p13 = scmp.ge.s32.totalorder %s876_s15, 2  ;;  %s469_s10 = scalar_lea.sflag [#allocation4], %s468_s26 }
 0x180   : > { %p702_p3 = pnand %p1202_p13, %p1201_p10 }
 0x182   : > { %859 = dma.done.wait (!%p702_p3), %s469_s10, 2048  }
 0x183   : > { %861 = vsyncadd (!%p702_p3), %s469_s10, 4294965248  ;;  %p17_p7 = scmp.ge.s32.totalorder %s963_s24, 4   ;;  %s1203_s12 = smov %s868_s13 }
 0x184   : > { %s1204_s13 = smov %s872_s14  ;;  %s1205_s14 = smov %s994_s17 }
 0x185   : > { %s1206_s15 = smov %s963_s24  ;;  %19 = sbr.rel (!%p17_p7) target bundleno = 6 (0x6), region = 81 }
 0x18c   :  { %474 = vsyncpa [#allocation3], 1 }
 0x18d   :  { %476 = vsyncpa [#allocation3 + $0x1], 1 }
 0x18e   :  { %477 = vsyncpa [#allocation6], 1 }
 0x18f   :  { %478 = vsyncpa [#allocation4], 1 }
 0x190   :  { %480 = vsyncpa [#allocation4 + $0x1], 1 }

</bundles_post_ra>
